<compile_context>
chip_gen: v6e
topology: v6e:2x2x1
jax: 0.10.0
libtpu: 0.0.40
codegen_flags: <defaults>
</compile_context>

<pallas_src>
import jax
import jax.numpy as jnp
from jax.experimental import pallas as pl
from jax.experimental.pallas import tpu as pltpu

# ----------------------- model hyper-parameters (small) -----------------------
OUTPUT_DIM = 16        # vocab size V
EMBED_DIM = 32         # E
HIDDEN_DIM = 32        # H
N_LAYERS = 2
BIDIRECTIONAL = False  # kernel implements the unidirectional branch
BATCH = 8              # padded to one sublane tile (perf review)
SEQ_LEN = 8            # number of decode steps fused into one pallas_call


# ------------------------------ fused Pallas kernel ----------------------------
def _lstm_cell(gates, c_prev, H):
    # One sigmoid pass over all 4H gate lanes + tanh only on the g slice.
    sig = jax.nn.sigmoid(gates)
    i_g = sig[:, 0:H]
    f_g = sig[:, H:2 * H]
    o_g = sig[:, 3 * H:4 * H]
    g_g = jnp.tanh(gates[:, 2 * H:3 * H])
    c_new = f_g * c_prev + i_g * g_g
    h_new = o_g * jnp.tanh(c_new)
    return h_new, c_new


def _decoder_seq_kernel(tok_ref,                      # SMEM (T, B) int32 (prefetch)
                        table0_ref, whh0_ref, w_hi_ref, b_ref,
                        fcw_ref, fcb_ref, h0_ref, c0_ref,
                        out_ref, h_out_ref, c_out_ref):
    t = pl.program_id(0)
    L, B, H = h_out_ref.shape
    V = out_ref.shape[-1]

    # Initialize the VMEM-resident state from the caller's hidden at step 0.
    # (h_out/c_out have a constant block index, so they persist across steps.)
    @pl.when(t == 0)
    def _():
        h_out_ref[...] = h0_ref[...]
        c_out_ref[...] = c0_ref[...]

    # ---- Embedding lookup (folded into layer 0) -------------------------------
    # Build the (B, V) one-hot from SMEM token scalars.  Matches nn.Embedding for
    # in-range ids; out-of-range ids yield a zero embedding instead of raising.
    lane_ids = jax.lax.broadcasted_iota(jnp.int32, (B, V), 1)
    row_ids = jax.lax.broadcasted_iota(jnp.int32, (B, V), 0)
    onehot = jnp.zeros((B, V), jnp.float32)
    for b in range(B):
        tok_b = tok_ref[t, b]
        onehot = jnp.where((row_ids == b) & (lane_ids == tok_b), 1.0, onehot)

    # Dropout(0.5) on the embedded input: eval-mode semantics -> identity.
    # TODO(synk): training-mode stochastic dropout (pltpu.prng_*) not wired in.

    # ---- Layer 0: gates = onehot @ (emb @ W_ih0^T) + h_prev @ W_hh0^T + b0 ----
    h_prev = h_out_ref[0]
    c_prev = c_out_ref[0]
    gates = (jnp.dot(onehot, table0_ref[...], preferred_element_type=jnp.float32)
             + jnp.dot(h_prev, whh0_ref[...], preferred_element_type=jnp.float32)
             + b_ref[0])
    h_new, c_new = _lstm_cell(gates, c_prev, H)
    h_out_ref[0] = h_new
    c_out_ref[0] = c_new
    x = h_new

    # ---- Layers 1..L-1: fused concat-dot against stacked [W_ih^T ; W_hh^T] ----
    # (nn.LSTM inter-layer dropout defaults to 0.)
    for l in range(1, L):
        h_prev = h_out_ref[l]
        c_prev = c_out_ref[l]
        xh = jnp.concatenate([x, h_prev], axis=1)                 # (B, 2H)
        gates = (jnp.dot(xh, w_hi_ref[l - 1], preferred_element_type=jnp.float32)
                 + b_ref[l])                                      # (B, 4H)
        h_new, c_new = _lstm_cell(gates, c_prev, H)
        h_out_ref[l] = h_new
        c_out_ref[l] = c_new
        x = h_new

    # ---- FC + LogSoftmax(dim=1) ------------------------------------------------
    logits = (jnp.dot(x, fcw_ref[...], preferred_element_type=jnp.float32)
              + fcb_ref[...])                                     # (B, V)
    m = jnp.max(logits, axis=1, keepdims=True)
    lse = jnp.log(jnp.sum(jnp.exp(logits - m), axis=1, keepdims=True)) + m
    out_ref[0] = (logits - lse).astype(out_ref.dtype)


# ------------------------------ pallas_call wrapper ----------------------------
def _cost_estimate(T, B, V, H, L):
    per_step = 2 * B * V * 4 * H                      # onehot @ table0
    per_step += 2 * B * H * 4 * H                     # h0 @ whh0
    per_step += (L - 1) * 2 * B * (2 * H) * 4 * H     # upper-layer concat-dots
    per_step += L * 10 * B * H                        # gate elementwise (approx)
    per_step += 2 * B * H * V + 4 * B * V             # fc + log-softmax
    transcendentals = T * (L * 6 * B * H + B * V)
    bytes_accessed = 4 * (V * 4 * H + H * 4 * H + (L - 1) * 2 * H * 4 * H
                          + L * 4 * H + H * V + V + 4 * L * B * H
                          + T * B * V + T * B)
    return pl.CostEstimate(flops=T * per_step, transcendentals=transcendentals,
                           bytes_accessed=bytes_accessed)


def decoder_pallas_call(tokens, table0, whh0_t, w_hi, b_stacked, fc_w_t, fc_b,
                        h0, c0):
    """tokens: (T, B) int32.  Returns (log_probs (T,B,V), (h (L,B,H), c (L,B,H)))."""
    T, B = tokens.shape
    V = table0.shape[0]
    L, _, H = h0.shape

    grid_spec = pltpu.PrefetchScalarGridSpec(
        num_scalar_prefetch=1,              # tokens -> SMEM, read as scalars
        grid=(T,),
        in_specs=[
            # Constant block index => each weight is DMA'd once and stays in VMEM.
            pl.BlockSpec(table0.shape, lambda t, tok: (0, 0)),
            pl.BlockSpec(whh0_t.shape, lambda t, tok: (0, 0)),
            pl.BlockSpec(w_hi.shape, lambda t, tok: (0, 0, 0)),
            pl.BlockSpec(b_stacked.shape, lambda t, tok: (0, 0, 0)),
            pl.BlockSpec(fc_w_t.shape, lambda t, tok: (0, 0)),
            pl.BlockSpec(fc_b.shape, lambda t, tok: (0, 0)),
            pl.BlockSpec(h0.shape, lambda t, tok: (0, 0, 0)),
            pl.BlockSpec(c0.shape, lambda t, tok: (0, 0, 0)),
        ],
        out_specs=[
            pl.BlockSpec((1, B, V), lambda t, tok: (t, 0, 0)),     # per-step logits
            pl.BlockSpec((L, B, H), lambda t, tok: (0, 0, 0)),     # resident h state
            pl.BlockSpec((L, B, H), lambda t, tok: (0, 0, 0)),     # resident c state
        ],
    )

    out, h1, c1 = pl.pallas_call(
        _decoder_seq_kernel,
        grid_spec=grid_spec,
        out_shape=(
            jax.ShapeDtypeStruct((T, B, V), jnp.float32),
            jax.ShapeDtypeStruct((L, B, H), jnp.float32),
            jax.ShapeDtypeStruct((L, B, H), jnp.float32),
        ),
        compiler_params=pltpu.CompilerParams(
            dimension_semantics=("arbitrary",)),    # steps are sequentially dependent
        cost_estimate=_cost_estimate(T, B, V, H, L),
    )(tokens.astype(jnp.int32), table0, whh0_t, w_hi, b_stacked, fc_w_t, fc_b,
      h0, c0)
    return out, (h1, c1)


@jax.jit
def decoder_forward(params, tokens, h0, c0):
    """Fused teacher-forced decode over T steps.

    tokens: (T, B) int32; h0, c0: (N_LAYERS, B, H).
    Step t is exactly the PyTorch Decoder.forward(tokens[t], hidden)."""
    return decoder_pallas_call(
        tokens, params["table0"], params["whh0_t"], params["w_hi"],
        params["b_stacked"], params["fc_w_t"], params["fc_b"], h0, c0)


def decoder_step(params, token_batch, hidden):
    """Single-step API matching the PyTorch forward: input (B,), hidden (h, c)."""
    h0, c0 = hidden
    out, (h1, c1) = decoder_forward(params, token_batch.reshape(1, -1), h0, c0)
    return out[0], (h1, c1)


# ------------------------------ parameters & reference -------------------------
def init_params(key):
    ks = jax.random.split(key, 3 + 4 * N_LAYERS)
    scale = 0.1
    params = {}
    emb = scale * jax.random.normal(ks[0], (OUTPUT_DIM, EMBED_DIM), jnp.float32)
    params["embedding"] = emb
    wih_t, whh_t, bias = [], [], []
    for l in range(N_LAYERS):
        in_dim = EMBED_DIM if l == 0 else HIDDEN_DIM
        k0, k1, k2, k3 = ks[1 + 4 * l: 5 + 4 * l]
        # PyTorch stores (4H, in_dim) / (4H, H); we keep the transposed form.
        wih_t.append(scale * jax.random.normal(
            k0, (in_dim, 4 * HIDDEN_DIM), jnp.float32))
        whh_t.append(scale * jax.random.normal(
            k1, (HIDDEN_DIM, 4 * HIDDEN_DIM), jnp.float32))
        b_ih = scale * jax.random.normal(k2, (4 * HIDDEN_DIM,), jnp.float32)
        b_hh = scale * jax.random.normal(k3, (4 * HIDDEN_DIM,), jnp.float32)
        bias.append((b_ih + b_hh).reshape(1, 4 * HIDDEN_DIM))
    params["wih_t"], params["whh_t"], params["b"] = wih_t, whh_t, bias

    # ---- Fused-kernel operands ----
    # Embedding folded into layer-0 input weights: (V, 4H).
    params["table0"] = emb @ wih_t[0]
    params["whh0_t"] = whh_t[0]                                   # (H, 4H)
    if N_LAYERS > 1:
        params["w_hi"] = jnp.stack(
            [jnp.concatenate([wih_t[l], whh_t[l]], axis=0)
             for l in range(1, N_LAYERS)], axis=0)                # (L-1, 2H, 4H)
    else:
        # Dummy (never read when N_LAYERS == 1) to keep pallas_call shapes valid.
        params["w_hi"] = jnp.zeros((1, 2 * HIDDEN_DIM, 4 * HIDDEN_DIM), jnp.float32)
    params["b_stacked"] = jnp.stack(bias, axis=0)                 # (L, 1, 4H)
    kf1, kf2 = ks[-2], ks[-1]
    params["fc_w_t"] = scale * jax.random.normal(
        kf1, (HIDDEN_DIM, OUTPUT_DIM), jnp.float32)
    params["fc_b"] = scale * jax.random.normal(
        kf2, (1, OUTPUT_DIM), jnp.float32)
    return params


def _reference_forward_seq(params, tokens, h0, c0):
    """Pure-JAX reference: PyTorch Decoder.forward applied step-by-step."""
    H = HIDDEN_DIM
    h, c = h0, c0
    outs = []
    for t in range(tokens.shape[0]):
        x = jnp.take(params["embedding"], tokens[t], axis=0)
        hs, cs = [], []
        for l in range(N_LAYERS):
            gates = (x @ params["wih_t"][l] + h[l] @ params["whh_t"][l]
                     + params["b"][l])
            i = jax.nn.sigmoid(gates[:, 0:H])
            f = jax.nn.sigmoid(gates[:, H:2 * H])
            g = jnp.tanh(gates[:, 2 * H:3 * H])
            o = jax.nn.sigmoid(gates[:, 3 * H:4 * H])
            c_l = f * c[l] + i * g
            h_l = o * jnp.tanh(c_l)
            hs.append(h_l)
            cs.append(c_l)
            x = h_l
        h, c = jnp.stack(hs), jnp.stack(cs)
        logits = x @ params["fc_w_t"] + params["fc_b"]
        outs.append(jax.nn.log_softmax(logits, axis=1))
    return jnp.stack(outs), (h, c)


if __name__ == "__main__":
    key = jax.random.PRNGKey(0)
    k_param, k_tok, k_h, k_c = jax.random.split(key, 4)

    params = init_params(k_param)
    tokens = jax.random.randint(k_tok, (SEQ_LEN, BATCH), 0, OUTPUT_DIM,
                                dtype=jnp.int32)
    h0 = 0.1 * jax.random.normal(k_h, (N_LAYERS, BATCH, HIDDEN_DIM), jnp.float32)
    c0 = 0.1 * jax.random.normal(k_c, (N_LAYERS, BATCH, HIDDEN_DIM), jnp.float32)

    # Fused multi-step decode.
    out, (h1, c1) = decoder_forward(params, tokens, h0, c0)
    jax.block_until_ready((out, h1, c1))

    ref_out, (ref_h, ref_c) = _reference_forward_seq(params, tokens, h0, c0)
    assert jnp.allclose(out, ref_out, atol=1e-5), "log-softmax output mismatch"
    assert jnp.allclose(h1, ref_h, atol=1e-5), "hidden state mismatch"
    assert jnp.allclose(c1, ref_c, atol=1e-5), "cell state mismatch"

    # Single-step API (matches the original PyTorch forward signature).
    step_out, _ = decoder_step(params, tokens[0], (h0, c0))
    jax.block_until_ready(step_out)
    assert jnp.allclose(step_out, ref_out[0], atol=1e-5), "single-step mismatch"

    print("KERNEL_OK")
</pallas_src>

<mosaic_0001>
module attributes {stable_mosaic.version = 11 : i64} {
  func.func @_decoder_seq_kernel(%arg0: i32, %arg1: memref<8x8xi32, #tpu.memory_space<smem>>, %arg2: memref<16x128xf32, #tpu.memory_space<vmem>>, %arg3: memref<32x128xf32, #tpu.memory_space<vmem>>, %arg4: memref<1x64x128xf32, #tpu.memory_space<vmem>>, %arg5: memref<2x1x128xf32, #tpu.memory_space<vmem>>, %arg6: memref<32x16xf32, #tpu.memory_space<vmem>>, %arg7: memref<1x16xf32, #tpu.memory_space<vmem>>, %arg8: memref<2x8x32xf32, #tpu.memory_space<vmem>>, %arg9: memref<2x8x32xf32, #tpu.memory_space<vmem>>, %arg10: memref<1x8x16xf32, #tpu.memory_space<vmem>>, %arg11: memref<2x8x32xf32, #tpu.memory_space<vmem>>, %arg12: memref<2x8x32xf32, #tpu.memory_space<vmem>>) attributes {dimension_semantics = [#tpu.dimension_semantics<arbitrary>], iteration_bounds = array<i64: 8>, scalar_prefetch = 1 : i64, scratch_operands = 0 : i64, tpu.core_type = #tpu.core_type<tc>, window_params = [{pipeline_mode = #tpu.pipeline_mode<synchronous>, transform_indices = @transform_0, window_bounds = array<i64: 16, 128>}, {pipeline_mode = #tpu.pipeline_mode<synchronous>, transform_indices = @transform_1, window_bounds = array<i64: 32, 128>}, {pipeline_mode = #tpu.pipeline_mode<synchronous>, transform_indices = @transform_2, window_bounds = array<i64: 1, 64, 128>}, {pipeline_mode = #tpu.pipeline_mode<synchronous>, transform_indices = @transform_3, window_bounds = array<i64: 2, 1, 128>}, {pipeline_mode = #tpu.pipeline_mode<synchronous>, transform_indices = @transform_4, window_bounds = array<i64: 32, 16>}, {pipeline_mode = #tpu.pipeline_mode<synchronous>, transform_indices = @transform_5, window_bounds = array<i64: 1, 16>}, {pipeline_mode = #tpu.pipeline_mode<synchronous>, transform_indices = @transform_6, window_bounds = array<i64: 2, 8, 32>}, {pipeline_mode = #tpu.pipeline_mode<synchronous>, transform_indices = @transform_7, window_bounds = array<i64: 2, 8, 32>}, {transform_indices = @transform_8, window_bounds = array<i64: 1, 8, 16>}, {pipeline_mode = #tpu.pipeline_mode<synchronous>, transform_indices = @transform_9, window_bounds = array<i64: 2, 8, 32>}, {pipeline_mode = #tpu.pipeline_mode<synchronous>, transform_indices = @transform_10, window_bounds = array<i64: 2, 8, 32>}]} {
    %c0_i32 = arith.constant 0 : i32
    %0 = arith.cmpi eq, %arg0, %c0_i32 : i32
    %1 = arith.extui %0 : i1 to i32
    %c0_i32_0 = arith.constant 0 : i32
    %2 = arith.cmpi ne, %1, %c0_i32_0 : i32
    scf.if %2 {
      %c0_62 = arith.constant 0 : index
      %c0_63 = arith.constant 0 : index
      %c0_64 = arith.constant 0 : index
      %164 = vector.load %arg8[%c0_62, %c0_63, %c0_64] : memref<2x8x32xf32, #tpu.memory_space<vmem>>, vector<2x8x32xf32>
      %c0_65 = arith.constant 0 : index
      %c0_66 = arith.constant 0 : index
      %c0_67 = arith.constant 0 : index
      %165 = vector.load %arg11[%c0_65, %c0_66, %c0_67] : memref<2x8x32xf32, #tpu.memory_space<vmem>>, vector<2x8x32xf32>
      tpu.vector_store %arg11[%c0_65, %c0_66, %c0_67], %164 {strides = array<i32>} : memref<2x8x32xf32, #tpu.memory_space<vmem>>, vector<2x8x32xf32>,
      %c0_68 = arith.constant 0 : index
      %c0_69 = arith.constant 0 : index
      %c0_70 = arith.constant 0 : index
      %166 = vector.load %arg9[%c0_68, %c0_69, %c0_70] : memref<2x8x32xf32, #tpu.memory_space<vmem>>, vector<2x8x32xf32>
      %c0_71 = arith.constant 0 : index
      %c0_72 = arith.constant 0 : index
      %c0_73 = arith.constant 0 : index
      %167 = vector.load %arg12[%c0_71, %c0_72, %c0_73] : memref<2x8x32xf32, #tpu.memory_space<vmem>>, vector<2x8x32xf32>
      tpu.vector_store %arg12[%c0_71, %c0_72, %c0_73], %166 {strides = array<i32>} : memref<2x8x32xf32, #tpu.memory_space<vmem>>, vector<2x8x32xf32>,
    } else {
    }
    %3 = tpu.iota {dimensions = array<i32: 1>} : vector<8x16xi32>
    %4 = tpu.iota {dimensions = array<i32: 0>} : vector<8x16xi32>
    %cst = arith.constant 0.000000e+00 : f32
    %5 = vector.broadcast %cst : f32 to vector<8x16xf32>
    %6 = arith.index_cast %arg0 : i32 to index
    %c0 = arith.constant 0 : index
    %7 = memref.load %arg1[%6, %c0] : memref<8x8xi32, #tpu.memory_space<smem>>
    %c0_i32_1 = arith.constant 0 : i32
    %8 = vector.broadcast %c0_i32_1 : i32 to vector<8x16xi32>
    %9 = arith.cmpi eq, %4, %8 : vector<8x16xi32>
    %10 = vector.broadcast %7 : i32 to vector<8x16xi32>
    %11 = arith.cmpi eq, %3, %10 : vector<8x16xi32>
    %12 = arith.andi %9, %11 : vector<8x16xi1>
    %cst_2 = arith.constant 1.000000e+00 : f32
    %13 = vector.broadcast %cst_2 : f32 to vector<8x16xf32>
    %14 = arith.select %12, %13, %5 : vector<8x16xi1>, vector<8x16xf32>
    %15 = arith.index_cast %arg0 : i32 to index
    %c1 = arith.constant 1 : index
    %16 = memref.load %arg1[%15, %c1] : memref<8x8xi32, #tpu.memory_space<smem>>
    %c1_i32 = arith.constant 1 : i32
    %17 = vector.broadcast %c1_i32 : i32 to vector<8x16xi32>
    %18 = arith.cmpi eq, %4, %17 : vector<8x16xi32>
    %19 = vector.broadcast %16 : i32 to vector<8x16xi32>
    %20 = arith.cmpi eq, %3, %19 : vector<8x16xi32>
    %21 = arith.andi %18, %20 : vector<8x16xi1>
    %cst_3 = arith.constant 1.000000e+00 : f32
    %22 = vector.broadcast %cst_3 : f32 to vector<8x16xf32>
    %23 = arith.select %21, %22, %14 : vector<8x16xi1>, vector<8x16xf32>
    %24 = arith.index_cast %arg0 : i32 to index
    %c2 = arith.constant 2 : index
    %25 = memref.load %arg1[%24, %c2] : memref<8x8xi32, #tpu.memory_space<smem>>
    %c2_i32 = arith.constant 2 : i32
    %26 = vector.broadcast %c2_i32 : i32 to vector<8x16xi32>
    %27 = arith.cmpi eq, %4, %26 : vector<8x16xi32>
    %28 = vector.broadcast %25 : i32 to vector<8x16xi32>
    %29 = arith.cmpi eq, %3, %28 : vector<8x16xi32>
    %30 = arith.andi %27, %29 : vector<8x16xi1>
    %cst_4 = arith.constant 1.000000e+00 : f32
    %31 = vector.broadcast %cst_4 : f32 to vector<8x16xf32>
    %32 = arith.select %30, %31, %23 : vector<8x16xi1>, vector<8x16xf32>
    %33 = arith.index_cast %arg0 : i32 to index
    %c3 = arith.constant 3 : index
    %34 = memref.load %arg1[%33, %c3] : memref<8x8xi32, #tpu.memory_space<smem>>
    %c3_i32 = arith.constant 3 : i32
    %35 = vector.broadcast %c3_i32 : i32 to vector<8x16xi32>
    %36 = arith.cmpi eq, %4, %35 : vector<8x16xi32>
    %37 = vector.broadcast %34 : i32 to vector<8x16xi32>
    %38 = arith.cmpi eq, %3, %37 : vector<8x16xi32>
    %39 = arith.andi %36, %38 : vector<8x16xi1>
    %cst_5 = arith.constant 1.000000e+00 : f32
    %40 = vector.broadcast %cst_5 : f32 to vector<8x16xf32>
    %41 = arith.select %39, %40, %32 : vector<8x16xi1>, vector<8x16xf32>
    %42 = arith.index_cast %arg0 : i32 to index
    %c4 = arith.constant 4 : index
    %43 = memref.load %arg1[%42, %c4] : memref<8x8xi32, #tpu.memory_space<smem>>
    %c4_i32 = arith.constant 4 : i32
    %44 = vector.broadcast %c4_i32 : i32 to vector<8x16xi32>
    %45 = arith.cmpi eq, %4, %44 : vector<8x16xi32>
    %46 = vector.broadcast %43 : i32 to vector<8x16xi32>
    %47 = arith.cmpi eq, %3, %46 : vector<8x16xi32>
    %48 = arith.andi %45, %47 : vector<8x16xi1>
    %cst_6 = arith.constant 1.000000e+00 : f32
    %49 = vector.broadcast %cst_6 : f32 to vector<8x16xf32>
    %50 = arith.select %48, %49, %41 : vector<8x16xi1>, vector<8x16xf32>
    %51 = arith.index_cast %arg0 : i32 to index
    %c5 = arith.constant 5 : index
    %52 = memref.load %arg1[%51, %c5] : memref<8x8xi32, #tpu.memory_space<smem>>
    %c5_i32 = arith.constant 5 : i32
    %53 = vector.broadcast %c5_i32 : i32 to vector<8x16xi32>
    %54 = arith.cmpi eq, %4, %53 : vector<8x16xi32>
    %55 = vector.broadcast %52 : i32 to vector<8x16xi32>
    %56 = arith.cmpi eq, %3, %55 : vector<8x16xi32>
    %57 = arith.andi %54, %56 : vector<8x16xi1>
    %cst_7 = arith.constant 1.000000e+00 : f32
    %58 = vector.broadcast %cst_7 : f32 to vector<8x16xf32>
    %59 = arith.select %57, %58, %50 : vector<8x16xi1>, vector<8x16xf32>
    %60 = arith.index_cast %arg0 : i32 to index
    %c6 = arith.constant 6 : index
    %61 = memref.load %arg1[%60, %c6] : memref<8x8xi32, #tpu.memory_space<smem>>
    %c6_i32 = arith.constant 6 : i32
    %62 = vector.broadcast %c6_i32 : i32 to vector<8x16xi32>
    %63 = arith.cmpi eq, %4, %62 : vector<8x16xi32>
    %64 = vector.broadcast %61 : i32 to vector<8x16xi32>
    %65 = arith.cmpi eq, %3, %64 : vector<8x16xi32>
    %66 = arith.andi %63, %65 : vector<8x16xi1>
    %cst_8 = arith.constant 1.000000e+00 : f32
    %67 = vector.broadcast %cst_8 : f32 to vector<8x16xf32>
    %68 = arith.select %66, %67, %59 : vector<8x16xi1>, vector<8x16xf32>
    %69 = arith.index_cast %arg0 : i32 to index
    %c7 = arith.constant 7 : index
    %70 = memref.load %arg1[%69, %c7] : memref<8x8xi32, #tpu.memory_space<smem>>
    %c7_i32 = arith.constant 7 : i32
    %71 = vector.broadcast %c7_i32 : i32 to vector<8x16xi32>
    %72 = arith.cmpi eq, %4, %71 : vector<8x16xi32>
    %73 = vector.broadcast %70 : i32 to vector<8x16xi32>
    %74 = arith.cmpi eq, %3, %73 : vector<8x16xi32>
    %75 = arith.andi %72, %74 : vector<8x16xi1>
    %cst_9 = arith.constant 1.000000e+00 : f32
    %76 = vector.broadcast %cst_9 : f32 to vector<8x16xf32>
    %77 = arith.select %75, %76, %68 : vector<8x16xi1>, vector<8x16xf32>
    %c0_10 = arith.constant 0 : index
    %c0_11 = arith.constant 0 : index
    %c0_12 = arith.constant 0 : index
    %78 = vector.load %arg11[%c0_10, %c0_11, %c0_12] : memref<2x8x32xf32, #tpu.memory_space<vmem>>, vector<1x8x32xf32>
    %79 = vector.shape_cast %78 : vector<1x8x32xf32> to vector<8x32xf32>
    %c0_13 = arith.constant 0 : index
    %c0_14 = arith.constant 0 : index
    %c0_15 = arith.constant 0 : index
    %80 = vector.load %arg12[%c0_13, %c0_14, %c0_15] : memref<2x8x32xf32, #tpu.memory_space<vmem>>, vector<1x8x32xf32>
    %81 = vector.shape_cast %80 : vector<1x8x32xf32> to vector<8x32xf32>
    %c0_16 = arith.constant 0 : index
    %c0_17 = arith.constant 0 : index
    %82 = vector.load %arg2[%c0_16, %c0_17] : memref<16x128xf32, #tpu.memory_space<vmem>>, vector<16x128xf32>
    %cst_18 = arith.constant dense<0.000000e+00> : vector<8x128xf32>
    %83 = tpu.matmul %77, %82, %cst_18 {dimension_numbers = #tpu.dot_dimension_numbers<[1], [0], [0], [1], [0, 0, 1, 1], [], []>} : vector<8x16xf32>, vector<16x128xf32>, vector<8x128xf32> -> vector<8x128xf32>
    %c0_19 = arith.constant 0 : index
    %c0_20 = arith.constant 0 : index
    %84 = vector.load %arg3[%c0_19, %c0_20] : memref<32x128xf32, #tpu.memory_space<vmem>>, vector<32x128xf32>
    %cst_21 = arith.constant dense<0.000000e+00> : vector<8x128xf32>
    %85 = tpu.matmul %79, %84, %cst_21 {dimension_numbers = #tpu.dot_dimension_numbers<[1], [0], [0], [1], [0, 0, 1, 1], [], []>} : vector<8x32xf32>, vector<32x128xf32>, vector<8x128xf32> -> vector<8x128xf32>
    %86 = arith.addf %83, %85 : vector<8x128xf32>
    %c0_22 = arith.constant 0 : index
    %c0_23 = arith.constant 0 : index
    %c0_24 = arith.constant 0 : index
    %87 = vector.load %arg5[%c0_22, %c0_23, %c0_24] : memref<2x1x128xf32, #tpu.memory_space<vmem>>, vector<1x1x128xf32>
    %88 = vector.shape_cast %87 : vector<1x1x128xf32> to vector<1x128xf32>
    %89 = vector.broadcast %88 : vector<1x128xf32> to vector<8x128xf32>
    %90 = arith.addf %86, %89 : vector<8x128xf32>
    %91 = arith.negf %90 : vector<8x128xf32>
    %92 = math.exp %91 : vector<8x128xf32>
    %cst_25 = arith.constant 1.000000e+00 : f32
    %93 = vector.broadcast %cst_25 : f32 to vector<8x128xf32>
    %94 = arith.addf %93, %92 : vector<8x128xf32>
    %95 = arith.divf %93, %94 : vector<8x128xf32>
    %96 = vector.extract_strided_slice %95 {offsets = [0, 0], sizes = [8, 32], strides = [1, 1]} : vector<8x128xf32> to vector<8x32xf32>
    %97 = vector.extract_strided_slice %95 {offsets = [0, 32], sizes = [8, 32], strides = [1, 1]} : vector<8x128xf32> to vector<8x32xf32>
    %98 = vector.extract_strided_slice %95 {offsets = [0, 96], sizes = [8, 32], strides = [1, 1]} : vector<8x128xf32> to vector<8x32xf32>
    %99 = vector.extract_strided_slice %90 {offsets = [0, 64], sizes = [8, 32], strides = [1, 1]} : vector<8x128xf32> to vector<8x32xf32>
    %100 = math.tanh %99 : vector<8x32xf32>
    %101 = arith.mulf %97, %81 : vector<8x32xf32>
    %102 = arith.mulf %96, %100 : vector<8x32xf32>
    %103 = arith.addf %101, %102 : vector<8x32xf32>
    %104 = math.tanh %103 : vector<8x32xf32>
    %105 = arith.mulf %98, %104 : vector<8x32xf32>
    %c0_26 = arith.constant 0 : index
    %c0_27 = arith.constant 0 : index
    %c0_28 = arith.constant 0 : index
    %106 = vector.load %arg11[%c0_26, %c0_27, %c0_28] : memref<2x8x32xf32, #tpu.memory_space<vmem>>, vector<1x8x32xf32>
    %107 = vector.shape_cast %106 : vector<1x8x32xf32> to vector<8x32xf32>
    %108 = vector.shape_cast %105 : vector<8x32xf32> to vector<1x8x32xf32>
    tpu.vector_store %arg11[%c0_26, %c0_27, %c0_28], %108 {strides = array<i32>} : memref<2x8x32xf32, #tpu.memory_space<vmem>>, vector<1x8x32xf32>,
    %c0_29 = arith.constant 0 : index
    %c0_30 = arith.constant 0 : index
    %c0_31 = arith.constant 0 : index
    %109 = vector.load %arg12[%c0_29, %c0_30, %c0_31] : memref<2x8x32xf32, #tpu.memory_space<vmem>>, vector<1x8x32xf32>
    %110 = vector.shape_cast %109 : vector<1x8x32xf32> to vector<8x32xf32>
    %111 = vector.shape_cast %103 : vector<8x32xf32> to vector<1x8x32xf32>
    tpu.vector_store %arg12[%c0_29, %c0_30, %c0_31], %111 {strides = array<i32>} : memref<2x8x32xf32, #tpu.memory_space<vmem>>, vector<1x8x32xf32>,
    %c1_32 = arith.constant 1 : index
    %c0_33 = arith.constant 0 : index
    %c0_34 = arith.constant 0 : index
    %112 = vector.load %arg11[%c1_32, %c0_33, %c0_34] : memref<2x8x32xf32, #tpu.memory_space<vmem>>, vector<1x8x32xf32>
    %113 = vector.shape_cast %112 : vector<1x8x32xf32> to vector<8x32xf32>
    %c1_35 = arith.constant 1 : index
    %c0_36 = arith.constant 0 : index
    %c0_37 = arith.constant 0 : index
    %114 = vector.load %arg12[%c1_35, %c0_36, %c0_37] : memref<2x8x32xf32, #tpu.memory_space<vmem>>, vector<1x8x32xf32>
    %115 = vector.shape_cast %114 : vector<1x8x32xf32> to vector<8x32xf32>
    %116 = tpu.concatenate %105, %113 in 1 : vector<8x32xf32>, vector<8x32xf32> -> vector<8x64xf32>
    %c0_38 = arith.constant 0 : index
    %c0_39 = arith.constant 0 : index
    %c0_40 = arith.constant 0 : index
    %117 = vector.load %arg4[%c0_38, %c0_39, %c0_40] : memref<1x64x128xf32, #tpu.memory_space<vmem>>, vector<1x64x128xf32>
    %118 = vector.shape_cast %117 : vector<1x64x128xf32> to vector<64x128xf32>
    %cst_41 = arith.constant dense<0.000000e+00> : vector<8x128xf32>
    %119 = tpu.matmul %116, %118, %cst_41 {dimension_numbers = #tpu.dot_dimension_numbers<[1], [0], [0], [1], [0, 0, 1, 1], [], []>} : vector<8x64xf32>, vector<64x128xf32>, vector<8x128xf32> -> vector<8x128xf32>
    %c1_42 = arith.constant 1 : index
    %c0_43 = arith.constant 0 : index
    %c0_44 = arith.constant 0 : index
    %120 = vector.load %arg5[%c1_42, %c0_43, %c0_44] : memref<2x1x128xf32, #tpu.memory_space<vmem>>, vector<1x1x128xf32>
    %121 = vector.shape_cast %120 : vector<1x1x128xf32> to vector<1x128xf32>
    %122 = vector.broadcast %121 : vector<1x128xf32> to vector<8x128xf32>
    %123 = arith.addf %119, %122 : vector<8x128xf32>
    %124 = arith.negf %123 : vector<8x128xf32>
    %125 = math.exp %124 : vector<8x128xf32>
    %cst_45 = arith.constant 1.000000e+00 : f32
    %126 = vector.broadcast %cst_45 : f32 to vector<8x128xf32>
    %127 = arith.addf %126, %125 : vector<8x128xf32>
    %128 = arith.divf %126, %127 : vector<8x128xf32>
    %129 = vector.extract_strided_slice %128 {offsets = [0, 0], sizes = [8, 32], strides = [1, 1]} : vector<8x128xf32> to vector<8x32xf32>
    %130 = vector.extract_strided_slice %128 {offsets = [0, 32], sizes = [8, 32], strides = [1, 1]} : vector<8x128xf32> to vector<8x32xf32>
    %131 = vector.extract_strided_slice %128 {offsets = [0, 96], sizes = [8, 32], strides = [1, 1]} : vector<8x128xf32> to vector<8x32xf32>
    %132 = vector.extract_strided_slice %123 {offsets = [0, 64], sizes = [8, 32], strides = [1, 1]} : vector<8x128xf32> to vector<8x32xf32>
    %133 = math.tanh %132 : vector<8x32xf32>
    %134 = arith.mulf %130, %115 : vector<8x32xf32>
    %135 = arith.mulf %129, %133 : vector<8x32xf32>
    %136 = arith.addf %134, %135 : vector<8x32xf32>
    %137 = math.tanh %136 : vector<8x32xf32>
    %138 = arith.mulf %131, %137 : vector<8x32xf32>
    %c1_46 = arith.constant 1 : index
    %c0_47 = arith.constant 0 : index
    %c0_48 = arith.constant 0 : index
    %139 = vector.load %arg11[%c1_46, %c0_47, %c0_48] : memref<2x8x32xf32, #tpu.memory_space<vmem>>, vector<1x8x32xf32>
    %140 = vector.shape_cast %139 : vector<1x8x32xf32> to vector<8x32xf32>
    %141 = vector.shape_cast %138 : vector<8x32xf32> to vector<1x8x32xf32>
    tpu.vector_store %arg11[%c1_46, %c0_47, %c0_48], %141 {strides = array<i32>} : memref<2x8x32xf32, #tpu.memory_space<vmem>>, vector<1x8x32xf32>,
    %c1_49 = arith.constant 1 : index
    %c0_50 = arith.constant 0 : index
    %c0_51 = arith.constant 0 : index
    %142 = vector.load %arg12[%c1_49, %c0_50, %c0_51] : memref<2x8x32xf32, #tpu.memory_space<vmem>>, vector<1x8x32xf32>
    %143 = vector.shape_cast %142 : vector<1x8x32xf32> to vector<8x32xf32>
    %144 = vector.shape_cast %136 : vector<8x32xf32> to vector<1x8x32xf32>
    tpu.vector_store %arg12[%c1_49, %c0_50, %c0_51], %144 {strides = array<i32>} : memref<2x8x32xf32, #tpu.memory_space<vmem>>, vector<1x8x32xf32>,
    %c0_52 = arith.constant 0 : index
    %c0_53 = arith.constant 0 : index
    %145 = vector.load %arg6[%c0_52, %c0_53] : memref<32x16xf32, #tpu.memory_space<vmem>>, vector<32x16xf32>
    %cst_54 = arith.constant dense<0.000000e+00> : vector<8x16xf32>
    %146 = tpu.matmul %138, %145, %cst_54 {dimension_numbers = #tpu.dot_dimension_numbers<[1], [0], [0], [1], [0, 0, 1, 1], [], []>} : vector<8x32xf32>, vector<32x16xf32>, vector<8x16xf32> -> vector<8x16xf32>
    %c0_55 = arith.constant 0 : index
    %c0_56 = arith.constant 0 : index
    %147 = vector.load %arg7[%c0_55, %c0_56] : memref<1x16xf32, #tpu.memory_space<vmem>>, vector<1x16xf32>
    %148 = vector.broadcast %147 : vector<1x16xf32> to vector<8x16xf32>
    %149 = arith.addf %146, %148 : vector<8x16xf32>
    %cst_57 = arith.constant dense<0xFF800000> : vector<8xf32>
    %150 = vector.multi_reduction <maximumf>, %149, %cst_57 [1] : vector<8x16xf32> to vector<8xf32>
    %151 = vector.shape_cast %150 : vector<8xf32> to vector<8x1xf32>
    %152 = vector.broadcast %151 : vector<8x1xf32> to vector<8x16xf32>
    %153 = arith.subf %149, %152 : vector<8x16xf32>
    %154 = math.exp %153 : vector<8x16xf32>
    %cst_58 = arith.constant dense<0.000000e+00> : vector<8xf32>
    %155 = vector.multi_reduction <add>, %154, %cst_58 [1] : vector<8x16xf32> to vector<8xf32>
    %156 = vector.shape_cast %155 : vector<8xf32> to vector<8x1xf32>
    %157 = math.log %156 : vector<8x1xf32>
    %158 = arith.addf %157, %151 : vector<8x1xf32>
    %159 = vector.broadcast %158 : vector<8x1xf32> to vector<8x16xf32>
    %160 = arith.subf %149, %159 : vector<8x16xf32>
    %c0_59 = arith.constant 0 : index
    %c0_60 = arith.constant 0 : index
    %c0_61 = arith.constant 0 : index
    %161 = vector.load %arg10[%c0_59, %c0_60, %c0_61] : memref<1x8x16xf32, #tpu.memory_space<vmem>>, vector<1x8x16xf32>
    %162 = vector.shape_cast %161 : vector<1x8x16xf32> to vector<8x16xf32>
    %163 = vector.shape_cast %160 : vector<8x16xf32> to vector<1x8x16xf32>
    tpu.vector_store %arg10[%c0_59, %c0_60, %c0_61], %163 {strides = array<i32>} : memref<1x8x16xf32, #tpu.memory_space<vmem>>, vector<1x8x16xf32>,
    return
  }
  func.func @transform_0(%arg0: i32, %arg1: memref<8x8xi32, #tpu.memory_space<smem>>) -> (i32, i32) {
    %c0_i32 = arith.constant 0 : i32
    %c0_i32_0 = arith.constant 0 : i32
    %c0_i32_1 = arith.constant 0 : i32
    return %c0_i32, %c0_i32_0 : i32, i32
  }
  func.func @transform_1(%arg0: i32, %arg1: memref<8x8xi32, #tpu.memory_space<smem>>) -> (i32, i32) {
    %c0_i32 = arith.constant 0 : i32
    %c0_i32_0 = arith.constant 0 : i32
    %c0_i32_1 = arith.constant 0 : i32
    return %c0_i32, %c0_i32_0 : i32, i32
  }
  func.func @transform_2(%arg0: i32, %arg1: memref<8x8xi32, #tpu.memory_space<smem>>) -> (i32, i32, i32) {
    %c0_i32 = arith.constant 0 : i32
    %c0_i32_0 = arith.constant 0 : i32
    %c0_i32_1 = arith.constant 0 : i32
    %c0_i32_2 = arith.constant 0 : i32
    return %c0_i32, %c0_i32_0, %c0_i32_1 : i32, i32, i32
  }
  func.func @transform_3(%arg0: i32, %arg1: memref<8x8xi32, #tpu.memory_space<smem>>) -> (i32, i32, i32) {
    %c0_i32 = arith.constant 0 : i32
    %c0_i32_0 = arith.constant 0 : i32
    %c0_i32_1 = arith.constant 0 : i32
    %c0_i32_2 = arith.constant 0 : i32
    return %c0_i32, %c0_i32_0, %c0_i32_1 : i32, i32, i32
  }
  func.func @transform_4(%arg0: i32, %arg1: memref<8x8xi32, #tpu.memory_space<smem>>) -> (i32, i32) {
    %c0_i32 = arith.constant 0 : i32
    %c0_i32_0 = arith.constant 0 : i32
    %c0_i32_1 = arith.constant 0 : i32
    return %c0_i32, %c0_i32_0 : i32, i32
  }
  func.func @transform_5(%arg0: i32, %arg1: memref<8x8xi32, #tpu.memory_space<smem>>) -> (i32, i32) {
    %c0_i32 = arith.constant 0 : i32
    %c0_i32_0 = arith.constant 0 : i32
    %c0_i32_1 = arith.constant 0 : i32
    return %c0_i32, %c0_i32_0 : i32, i32
  }
  func.func @transform_6(%arg0: i32, %arg1: memref<8x8xi32, #tpu.memory_space<smem>>) -> (i32, i32, i32) {
    %c0_i32 = arith.constant 0 : i32
    %c0_i32_0 = arith.constant 0 : i32
    %c0_i32_1 = arith.constant 0 : i32
    %c0_i32_2 = arith.constant 0 : i32
    return %c0_i32, %c0_i32_0, %c0_i32_1 : i32, i32, i32
  }
  func.func @transform_7(%arg0: i32, %arg1: memref<8x8xi32, #tpu.memory_space<smem>>) -> (i32, i32, i32) {
    %c0_i32 = arith.constant 0 : i32
    %c0_i32_0 = arith.constant 0 : i32
    %c0_i32_1 = arith.constant 0 : i32
    %c0_i32_2 = arith.constant 0 : i32
    return %c0_i32, %c0_i32_0, %c0_i32_1 : i32, i32, i32
  }
  func.func @transform_8(%arg0: i32, %arg1: memref<8x8xi32, #tpu.memory_space<smem>>) -> (i32, i32, i32) {
    %c0_i32 = arith.constant 0 : i32
    %c0_i32_0 = arith.constant 0 : i32
    %c0_i32_1 = arith.constant 0 : i32
    return %arg0, %c0_i32, %c0_i32_0 : i32, i32, i32
  }
  func.func @transform_9(%arg0: i32, %arg1: memref<8x8xi32, #tpu.memory_space<smem>>) -> (i32, i32, i32) {
    %c0_i32 = arith.constant 0 : i32
    %c0_i32_0 = arith.constant 0 : i32
    %c0_i32_1 = arith.constant 0 : i32
    %c0_i32_2 = arith.constant 0 : i32
    return %c0_i32, %c0_i32_0, %c0_i32_1 : i32, i32, i32
  }
  func.func @transform_10(%arg0: i32, %arg1: memref<8x8xi32, #tpu.memory_space<smem>>) -> (i32, i32, i32) {
    %c0_i32 = arith.constant 0 : i32
    %c0_i32_0 = arith.constant 0 : i32
    %c0_i32_1 = arith.constant 0 : i32
    %c0_i32_2 = arith.constant 0 : i32
    return %c0_i32, %c0_i32_0, %c0_i32_1 : i32, i32, i32
  }
}

</mosaic_0001>

<bundles_post_ra>
// kernel: decoder_forward.1
= control target key start
LH: loop header
LB: loop body
LE: loop exit
PB: predicated region body
PF: predicated region fallthrough
CT: control target
= control target key end

     0   :  { %s1932_s0 = inlined_call_operand.vmem [shape: s32[8,8], index: 0, kind: input, shape index: {}]   ;;  %s1933_s1 = inlined_call_operand.vmem [shape: f32[16,128], index: 1, kind: input, shape index: {}]   ;;  %s1934_s2 = inlined_call_operand.vmem [shape: f32[32,128], index: 2, kind: input, shape index: {}]   ;;  %s1935_s3 = inlined_call_operand.hbm [shape: f32[1,64,128], index: 3, kind: input, shape index: {}]   ;;  %s1936_s4 = inlined_call_operand.hbm [shape: f32[2,1,128], index: 4, kind: input, shape index: {}]   ;;  %s1937_s5 = inlined_call_operand.vmem [shape: f32[32,16], index: 5, kind: input, shape index: {}]   ;;  %s1938_s6 = inlined_call_operand.vmem [shape: f32[1,16], index: 6, kind: input, shape index: {}]   ;;  %s1939_s7 = inlined_call_operand.hbm [shape: f32[2,8,32], index: 7, kind: input, shape index: {}]   ;;  %s1940_s8 = inlined_call_operand.hbm [shape: f32[2,8,32], index: 8, kind: input, shape index: {}]   ;;  %s1941_s9 = inlined_call_operand.hbm [shape: f32[8,8,16], index: 9, kind: output, shape index: {0}]   ;;  %s1942_s10 = inlined_call_operand.hbm [shape: f32[2,8,32], index: 10, kind: output, shape index: {1}]   ;;  %s1943_s11 = inlined_call_operand.hbm [shape: f32[2,8,32], index: 11, kind: output, shape index: {2}]  }
   0x1   :  { %1949 = sst [smem:[#allocation22_spill]] %s1933_s1  ;;  %s17_s19 = sshll.u32 %s1932_s0, 4  ;;  %s18_s19 = int_to_ptr.vmem [resolvable:$true] %s17_s19 }
   0x2   :  { %1950 = sst [smem:[#allocation23_spill]] %s1934_s2  ;;  %s1285_s20 = scalar_lea.vmem %s18_s19, 128 }
   0x3   :  { %1951 = sst [smem:[#allocation24_spill]] %s1936_s4  ;;  %p1286_p0 = scmp.ne.s32.totalorder %s18_s19, %s1285_s20 }
   0x4   :  { %p1290_p1 = scmp.lt.s32.totalorder %s18_s19, %s18_s19  ;;  %p1291_p2 = scmp.lt.s32.totalorder %s1285_s20, %s1285_s20 }
   0x6   :  { %p1292_p3 = por %p1291_p2, %p1290_p1 }
   0x8   :  { %p1293_p4 = pnand %p1292_p3, %p1286_p0 }
   0xa   :  { %1296 = shalt.err (!%p1293_p4)  }
   0xb   :  { %s1529_s21 = smov [#allocation3]  }
   0xc   :  { %20 = dma.vmem_to_smem %s18_s19, 128, %s1529_s21, [#allocation2] }
   0xd   :  { %1491 = dma.done.wait [#allocation2], 128 }
   0xe   :  { %1492 = vsyncadd [#allocation2], 4294967168 }
   0xf   :  { %22 = sfence }
  0x10   :  { %23 = vsyncpa [#allocation5], 0 }
  0x11   :  { %24 = vsyncpa [#allocation8], 0 }
  0x12   :  { %25 = vsyncpa [#allocation11], 0 }
  0x13   :  { %26 = vsyncpa [#allocation6], 0 }
  0x14   :  { %28 = vsyncpa [#allocation6 + $0x1], 0 }
  0x15   :  { %29 = vsyncpa [#allocation14], 0  ;;  %s1611_s0 = smov 0   ;;  %s1613_s22 = smov 0  }
  0x16   :  { %s1615_s23 = smov 0   ;;  %s1617_s24 = smov 0  }
  0x17 LB: > { %s1632_s25 = sadd.s32 4294967295, %s1527_s24   ;;  %s1058_s26 = sadd.s32 4294967294, %s1527_s24   ;;  %s1527_s24 = sphi %s1617_s24, %s1986_s24   ;;  %s1523_s23 = sphi %s1615_s23, %s1985_s23   ;;  %s1519_s22 = sphi %s1613_s22, %s1984_s22   ;;  %s1515_s0 = sphi %s1611_s0, %s1983_s0  }
  0x18   : > { %s1636_s27 = sadd.s32 1, %s1527_s24   ;;  %s210_s28 = sadd.s32 1, %s1523_s23 }
  0x19   : > { %s207_s29 = ssub.s32 %s1527_s24, %s1636_s27  ;;  %p220_p5 = scmp.ne.s32.totalorder %s1523_s23, %s1519_s22 }
  0x1a   : > { %p208_p6 = scmp.eq.s32.totalorder %s207_s29, 0  ;;  %p1944_p7 = scmp.eq.s32.totalorder %s1632_s25, 7 }
  0x1b   : > { %p226_p8 = scmp.ne.s32.totalorder %s1519_s22, %s1515_s0  ;;  %p227_p9 = scmp.eq.s32.totalorder %s1058_s26, 7 }
  0x1c   : > { %s1647_s30 = scalar_select %p208_p6, %s1523_s23, %s210_s28  }
  0x1d   : > { %p1651_p10 = por %p1944_p7, %p220_p5  ;;  %p1655_p11 = por %p227_p9, %p226_p8 }
  0x1e   : > { %p1059_p12 = scmp.ge.s32.totalorder %s1527_s24, 1  ;;  %p276_p13 = scmp.lt.s32.totalorder %s1527_s24, 9 }
  0x1f   : > { %s1953_s13 = scalar_select %p1655_p11, 1, 0 }
  0x20   : > { %p1945_p1 = scmp.eq.s32.totalorder %s1632_s25, 0  ;;  %p1663_p2 = pnand %p1059_p12, %p276_p13 }
  0x21   : > { %s1530_s15 = smov [#allocation7]   ;;  %s1531_s18 = smov [#allocation4]  }
  0x22   : > { %s307_s16 = sshll.u32 %s1530_s15, 4  ;;  %p1185_p3 = pneg %p1663_p2  ;;  %s308_s16 = int_to_ptr.vmem [resolvable:$true] %s307_s16 }
  0x23   : > { %s294_s19 = sshll.u32 %s1531_s18, 4  ;;  %s1308_s20 = scalar_lea.vmem %s308_s16, 32  ;;  %s295_s19 = int_to_ptr.vmem [resolvable:$true] %s294_s19 }
  0x24   : > { %p1671_p4 = pnand %p1945_p1, %p1185_p3  ;;  %p1309_p6 = scmp.ne.s32.totalorder %s308_s16, %s1308_s20 }
  0x25   : > { %p1316_p12 = scmp.lt.s32.totalorder %s308_s16, %s308_s16  ;;  %p1317_p13 = scmp.lt.s32.totalorder %s1308_s20, %s1308_s20 }
  0x26   : > { %p1299_p5 = pneg %p1671_p4 }
  0x27   : > { %p1318_p7 = por %p1317_p13, %p1316_p12 }
  0x28   : > { %p1311_p8 = pnand %p1309_p6, %p1299_p5 }
  0x2a   : > { %p1312_p9 = pneg %p1311_p8 }
  0x2c   : > { %p1319_p3 = pnand %p1318_p7, %p1312_p9 }
  0x2e   : > { %1322 = shalt.err (!%p1319_p3)
}
  0x2f   : > { %s1532_s21 = smov 16   ;;  %s1533_s26 = smov 1  }
  0x30   : > { %s1956_s4 = sld [smem:[#allocation24_spill]]  ;;  %s1334_s15 = scalar_lea.vmem %s295_s19, 1024 }
  0x31   : > { %p1335_p0 = scmp.ne.s32.totalorder %s295_s19, %s1334_s15  ;;  %p1342_p1 = scmp.lt.s32.totalorder %s295_s19, %s295_s19 }
  0x32   : > { %p1343_p11 = scmp.lt.s32.totalorder %s1334_s15, %s1334_s15 }
  0x33   : > { %p1337_p6 = pnand %p1335_p0, %p1299_p5 }
  0x34   : > { %p1344_p12 = por %p1343_p11, %p1342_p1 }
  0x35   : > { %p1338_p8 = pneg %p1337_p6 }
  0x36   : > { %1191 = dma.hbm_to_vmem [thread:$0]  (!%p1671_p4), %s1956_s4, 32, %s308_s16, [#allocation8], %s1532_s21, %s1532_s21, %s1533_s26  }
  0x37   : > { %p1345_p7 = pnand %p1344_p12, %p1338_p8 }
  0x39   : > { %1348 = shalt.err (!%p1345_p7)
}
  0x3a   : > { %s1534_s18 = smov 128   ;;  %s1535_s20 = smov 8  }
  0x3b   : > { %1188 = dma.hbm_to_vmem [thread:$0]  (!%p1671_p4), %s1935_s3, 1024, %s295_s19, [#allocation5], %s1534_s18, %s1534_s18, %s1535_s20  }
  0x3c   : > { %s1536_s26 = smov [#allocation9]   ;;  %s1537_s29 = smov [#allocation10]  }
  0x3d   : > { %s326_s28 = sshll.u32 %s1536_s26, 4  ;;  %s339_s4 = sshll.u32 %s1537_s29, 4  ;;  %s327_s28 = int_to_ptr.vmem [resolvable:$true] %s326_s28  ;;  %s340_s4 = int_to_ptr.vmem [resolvable:$true] %s339_s4 }
  0x3e   : > { %s1360_s15 = scalar_lea.vmem %s327_s28, 256  ;;  %p1368_p9 = scmp.lt.s32.totalorder %s327_s28, %s327_s28 }
  0x3f   : > { %p1361_p11 = scmp.ne.s32.totalorder %s327_s28, %s1360_s15  ;;  %p1369_p13 = scmp.lt.s32.totalorder %s1360_s15, %s1360_s15 }
  0x41   : > { %p1363_p0 = pnand %p1361_p11, %p1299_p5  ;;  %p1370_p3 = por %p1369_p13, %p1368_p9 }
  0x43   : > { %p1364_p1 = pneg %p1363_p0 }
  0x45   : > { %p1371_p6 = pnand %p1370_p3, %p1364_p1 }
  0x47   : > { %1374 = shalt.err (!%p1371_p6)
}
  0x48   : > { %1194 = dma.hbm_to_vmem [thread:$0]  (!%p1671_p4), %s1939_s7, 256, %s327_s28, [#allocation8], %s1534_s18, %s1534_s18, %s1535_s20  }
  0x49   : > { %s1386_s21 = scalar_lea.vmem %s340_s4, 256  ;;  %p1394_p11 = scmp.lt.s32.totalorder %s340_s4, %s340_s4 }
  0x4a   : > { %p1387_p8 = scmp.ne.s32.totalorder %s340_s4, %s1386_s21  ;;  %p1395_p0 = scmp.lt.s32.totalorder %s1386_s21, %s1386_s21 }
  0x4c   : > { %p1389_p12 = pnand %p1387_p8, %p1299_p5  ;;  %p1396_p1 = por %p1395_p0, %p1394_p11 }
  0x4e   : > { %p1390_p7 = pneg %p1389_p12 }
  0x50   : > { %p1397_p9 = pnand %p1396_p1, %p1390_p7 }
  0x52   : > { %1400 = shalt.err (!%p1397_p9)
}
  0x53   : > { %1197 = dma.hbm_to_vmem [thread:$0]  (!%p1671_p4), %s1940_s8, 256, %s340_s4, [#allocation11], %s1534_s18, %s1534_s18, %s1535_s20  }
  0x54   : > { %355 = sbr.rel (%p1663_p2) target bundleno = 2035 (0x7f3), region = 52  ;;  %p1957_p5 = scmp.eq.s32.totalorder (!%p1663_p2), %s1632_s25, 0 }
  0x59   : > { %1494 = dma.done.wait (%p1957_p5), [#allocation5], 1024   ;;  %p1958_p13 = pmov %p1957_p5 }
  0x5a   : > { %p1959_p3 = pmov %p1957_p5 }
  0x5b   : > { %1496 = vsyncadd (%p1958_p13), [#allocation5], 4294966272 }
  0x5c   : > { %1498 = dma.done.wait (%p1959_p3), [#allocation8], 288   ;;  %p1960_p6 = pmov %p1959_p3 }
  0x5d   : > { %p1961_p8 = pmov %p1959_p3 }
  0x5e   : > { %1500 = vsyncadd (%p1960_p6), [#allocation8], 4294967008 }
  0x5f   : > { %1502 = dma.done.wait (%p1961_p8), [#allocation11], 256   ;;  %p1962_p4 = pmov %p1959_p3 }
  0x60   : > { %s1946_s4 = sand.u32 1, %s1519_s22   ;;  %p1963_p2 = scmp.ne.s32.totalorder %s1632_s25, 0 }
  0x61   : > { %1504 = vsyncadd (%p1962_p4), [#allocation11], 4294967040  ;;  %s1735_s14 = sshll.u32 %s1946_s4, 3 }
  0x62   : > { %403 = sbr.rel (%p1963_p2) target bundleno = 106 (0x6a), region = 72 }
  0x67   : > { %v404_v0 = vld [vmem:[#allocation9] sm:$0xff]  ;;  %vm406_vm0 = vcmask 261120   ;;  %v405_v1 = vld [vmem:[#allocation9 + $0x8] sm:$0xff]  ;;  %v409_v2 = vld [vmem:[#allocation10] sm:$0xff] }
  0x68   : > { %407 = vst.msk [vmem:[#allocation13] sm:$0xff] %vm406_vm0, %v404_v0  ;;  %408 = vst.msk [vmem:[#allocation13 + $0x8] sm:$0xff] %vm406_vm0, %v405_v1  ;;  %v410_v3 = vld [vmem:[#allocation10 + $0x8] sm:$0xff] }
  0x69   : > { %411 = vst.msk [vmem:[#allocation15] sm:$0xff] %vm406_vm0, %v409_v2  ;;  %412 = vst.msk [vmem:[#allocation15 + $0x8] sm:$0xff] %vm406_vm0, %v410_v3 }
  0x6a PF: > { %s1964_s2 = sld [smem:[#allocation23_spill]]  ;;  %v413_v5 = vlaneseq  ;;  %v1538_v6 = vmov 0.0   ;;  %s1752_s21 = sshll.u32 %s1632_s25, 7  ;;  %vm1948_vm1 = vmmov 0   ;;  %vm1947_vm2 = vcmask 261120   ;;  %v691_v50 = vld [vmem:[#allocation4 + $0x38] sm:$0xff] }
  0x6b   : > { %1111 = vmatprep.subr.mxu0 %v1538_v6  ;;  %1122 = vmatprep.subr.mxu1 %v1538_v6  ;;  %s1965_s1 = sld [smem:[#allocation22_spill]]  ;;  %s424_s20 = sadd.s32 1, %s1752_s21  ;;  %v1074_v34 = vld [vmem:[#allocation7] ss:$0 sm:$0xff]  ;;  %v690_v51 = vld [vmem:[#allocation4 + $0x30] sm:$0xff]  ;;  %v689_v52 = vld [vmem:[#allocation4 + $0x28] sm:$0xff] }
  0x6c   : > { %1119 = vmatprep.mubr.msk.f32.mxu0 %vm1948_vm1, %v1538_v6  ;;  %s1760_s18 = sld [smem:[#allocation3 + %s1752_s21]]  ;;  %v1767_v11 = vshrl.u32 %v413_v5, 7  ;;  %s431_s16 = sadd.s32 2, %s1752_s21  ;;  %v414_v13 = vand.u32 127, %v413_v5  ;;  %1126 = vmatprep.mubr.msk.f32.mxu1 %vm1948_vm1, %v1538_v6  ;;  %v688_v53 = vld [vmem:[#allocation4 + $0x20] sm:$0xff]  ;;  %v687_v54 = vld [vmem:[#allocation4 + $0x18] sm:$0xff] }
  0x6d   : > { %s1769_s19 = sld [smem:[#allocation3 + %s424_s20]]  ;;  %s438_s29 = sadd.s32 3, %s1752_s21  ;;  %v686_v55 = vld [vmem:[#allocation4 + $0x10] sm:$0xff]  ;;  %v685_v57 = vld [vmem:[#allocation4 + $0x8] sm:$0xff]  ;;  %v684_v59 = vld [vmem:[#allocation4] sm:$0xff] }
  0x6e   : > { %s1773_s26 = sld [smem:[#allocation3 + %s431_s16]]  ;;  %s445_s28 = sadd.s32 4, %s1752_s21  ;;  %vm419_vm3 = vcmp.eq.s32.totalorder %v1767_v11, 0  ;;  %vm426_vm4 = vcmp.eq.s32.totalorder %v1767_v11, 1  ;;  %vm433_vm6 = vcmp.eq.s32.totalorder %v1767_v11, 2  ;;  %vm440_vm9 = vcmp.eq.s32.totalorder %v1767_v11, 3 }
  0x6f   : > { %s1780_s20 = sld [smem:[#allocation3 + %s438_s29]]  ;;  %v473_v14 = vld [vmem:[#allocation13] sm:$0xff]  ;;  %s452_s16 = sadd.s32 5, %s1752_s21  ;;  %vm447_vm12 = vcmp.eq.s32.totalorder %v1767_v11, 4  ;;  %vm454_vm15 = vcmp.eq.s32.totalorder %v1767_v11, 5  ;;  %v676_v58 = vld [vmem:[#allocation13 + $0x8] sm:$0xff] }
  0x70   : > { %v480_v4 = vld [vmem:[%s1964_s2 + $0x18] sm:$0xff]  ;;  %v479_v7 = vld [vmem:[%s1964_s2 + $0x10] sm:$0xff]  ;;  %v478_v10 = vld [vmem:[%s1964_s2 + $0x8] sm:$0xff]  ;;  %s1785_s15 = sld [smem:[#allocation3 + %s445_s28]]  ;;  %s459_s17 = sadd.s32 6, %s1752_s21 }
  0x71   : > { %v476_v8 = vld [vmem:[%s1965_s1 + $0x8] sm:$0xff]  ;;  %1112 = vmatpush3.msra.mxu0 %v480_v4  ;;  %v475_v9 = vld [vmem:[%s1965_s1] sm:$0xff]  ;;  %s1790_s4 = sld [smem:[#allocation3 + %s452_s16]]  ;;  %s466_s28 = sadd.s32 7, %s1752_s21 }
  0x72   : > { %1113 = vmatprep.subr.mxu0 %v1538_v6  ;;  %1123 = vmatpush3.msra.mxu1 %v476_v8  ;;  %v477_v12 = vld [vmem:[%s1964_s2] sm:$0xff]  ;;  %v420_v15 = vstv %s1760_s18  ;;  %s1796_s29 = sld [smem:[#allocation3 + %s459_s17]]  ;;  %s1540_s18 = smov 64   ;;  %v678_v60 = vld [vmem:[#allocation15 + $0x8] sm:$0xff] }
  0x73   : > { %1114 = vmatpush3.msra.mxu0 %v479_v7  ;;  %1124 = vmatprep.subr.mxu1 %v1538_v6  ;;  %vm421_vm5 = vcmp.eq.s32.totalorder %v414_v13, %v420_v15  ;;  %v427_v16 = vstv %s1769_s19  ;;  %s1802_s16 = sld [smem:[#allocation3 + %s466_s28]]  ;;  %v474_v39 = vld [vmem:[#allocation15] sm:$0xff]  ;;  %s1541_s19 = smov 32   ;;  %v1076_v2 = vld [vmem:[#allocation7 + $0x1] ss:$0 sm:$0xff] }
  0x74   : > { %1115 = vmatprep.subr.mxu0 %v1538_v6  ;;  %1125 = vmatpush3.msra.mxu1 %v475_v9  ;;  %vm422_vm7 = vmand %vm419_vm3, %vm421_vm5  ;;  %vm428_vm8 = vcmp.eq.s32.totalorder %v414_v13, %v427_v16  ;;  %v434_v17 = vstv %s1773_s26  ;;  %vm461_vm5 = vcmp.eq.s32.totalorder %v1767_v11, 6  ;;  %p1972_p7 = scmp.eq.s32.totalorder %s1632_s25, 7 }
  0x75   : > { %1116 = vmatpush3.msra.mxu0 %v478_v10  ;;  %1129 = vmatprep.subr.mxu1 %v1538_v6  ;;  %v423_v18 = vsel %vm422_vm7, 1.0, %v1538_v6  ;;  %vm429_vm10 = vmand %vm426_vm4, %vm428_vm8  ;;  %vm435_vm11 = vcmp.eq.s32.totalorder %v414_v13, %v434_v17  ;;  %v441_v19 = vstv %s1780_s20  ;;  %vm468_vm8 = vcmp.eq.s32.totalorder %v1767_v11, 7 }
  0x76   : > { %1117 = vmatprep.subr.mxu0 %v1538_v6  ;;  %v430_v20 = vsel %vm429_vm10, 1.0, %v423_v18  ;;  %vm436_vm13 = vmand %vm433_vm6, %vm435_vm11  ;;  %vm442_vm14 = vcmp.eq.s32.totalorder %v414_v13, %v441_v19  ;;  %v448_v21 = vstv %s1785_s15  ;;  %v815_v18 = vld [vmem:[%s1937_s5 + $0x18] sm:$0xff]  ;;  %v814_v19 = vld [vmem:[%s1937_s5 + $0x10] sm:$0xff] }
  0x77   : > { %1118 = vmatpush3.msra.mxu0 %v477_v12  ;;  %v437_v22 = vsel %vm436_vm13, 1.0, %v430_v20  ;;  %vm443_vm0 = vmand %vm440_vm9, %vm442_vm14  ;;  %vm449_vm3 = vcmp.eq.s32.totalorder %v414_v13, %v448_v21  ;;  %v455_v23 = vstv %s1790_s4  ;;  %vm1966_vm13 = vmmov 0   ;;  %v813_v20 = vld [vmem:[%s1937_s5 + $0x8] sm:$0xff]  ;;  %v812_v21 = vld [vmem:[%s1937_s5] sm:$0xff] }
  0x78   : > { %1120 = vmatmul.mubr.msk.f32.vlgmr.msra.gmra.mxu0 %vm1947_vm2, %v473_v14  ;;  %1148 = vmatprep.subr.mxu0 %v1538_v6  ;;  %v444_v24 = vsel %vm443_vm0, 1.0, %v437_v22  ;;  %vm450_vm4 = vmand %vm447_vm12, %vm449_vm3  ;;  %vm456_vm7 = vcmp.eq.s32.totalorder %v414_v13, %v455_v23  ;;  %v462_v25 = vstv %s1796_s29  ;;  %vm1967_vm12 = vcmask 261120  }
  0x79   : > { %1156 = vmatprep.mubr.msk.f32.mxu0 %vm1948_vm1, %v1538_v6  ;;  %v451_v26 = vsel %vm450_vm4, 1.0, %v444_v24  ;;  %vm457_vm10 = vmand %vm454_vm15, %vm456_vm7  ;;  %vm463_vm6 = vcmp.eq.s32.totalorder %v414_v13, %v462_v25  ;;  %v469_v27 = vstv %s1802_s16  ;;  %vm555_vm1 = vcmask 130048   ;;  %1149 = vmatpush3.msra.mxu0 %v815_v18 }
  0x7a   : > { %v458_v28 = vsel %vm457_vm10, 1.0, %v451_v26  ;;  %vm464_vm11 = vmand %vm461_vm5, %vm463_vm6  ;;  %vm470_vm2 = vcmp.eq.s32.totalorder %v414_v13, %v469_v27  ;;  %1150 = vmatprep.subr.mxu0 %v1538_v6  ;;  %v1079_v26 = vld [vmem:[%s1938_s6] ss:$0 sm:$0xff] }
  0x7b   : > { %v465_v29 = vsel %vm464_vm11, 1.0, %v458_v28  ;;  %vm471_vm9 = vmand %vm468_vm8, %vm470_vm2  ;;  %vm700_vm2 = vcmask 523264   ;;  %1151 = vmatpush3.msra.mxu0 %v814_v19 }
  0x7c   : > { %v472_v30 = vsel %vm471_vm9, 1.0, %v465_v29  ;;  %vm1968_vm14 = vmmov %vm1967_vm12  ;;  %1152 = vmatprep.subr.mxu0 %v1538_v6 }
  0x7d   : > { %1127 = vmatmul.mubr.msk.f32.vlgmr.msra.gmra.mxu1 %vm555_vm1, %v472_v30  ;;  %1153 = vmatpush3.msra.mxu0 %v813_v20  ;;  %vm1969_vm15 = vmmov %vm1967_vm12 }
  0x7e   : > { %1145 = vmatprep.mubr.msk.f32.mxu1 %vm1966_vm13, %v1538_v6  ;;  %1130 = vmatpush3.msra.mxu1 %v691_v50  ;;  %vm1970_vm0 = vmmov %vm1967_vm12 }
  0x7f   : > { %1131 = vmatprep.subr.mxu1 %v1538_v6  ;;  %1154 = vmatprep.subr.mxu0 %v1538_v6  ;;  %vm1971_vm3 = vmmov %vm1970_vm0 }
  0x80   : > { %1132 = vmatpush3.msra.mxu1 %v690_v51  ;;  %1155 = vmatpush3.msra.mxu0 %v812_v21 }
  0x81   : > { %1133 = vmatprep.subr.mxu1 %v1538_v6 }
  0x82   : > { %1134 = vmatpush3.msra.mxu1 %v689_v52 }
  0x83   : > { %1135 = vmatprep.subr.mxu1 %v1538_v6 }
  0x84   : > { %1136 = vmatpush3.msra.mxu1 %v688_v53 }
  0x85   : > { %1137 = vmatprep.subr.mxu1 %v1538_v6 }
  0x86   : > { %1138 = vmatpush3.msra.mxu1 %v687_v54 }
  0x87   : > { %1139 = vmatprep.subr.mxu1 %v1538_v6 }
  0x88   : > { %1140 = vmatpush3.msra.mxu1 %v686_v55 }
  0x89   : > { %1141 = vmatprep.subr.mxu1 %v1538_v6 }
  0x8a   : > { %1142 = vmatpush3.msra.mxu1 %v685_v57 }
  0x8b   : > { %1143 = vmatprep.subr.mxu1 %v1538_v6 }
  0x8c   : > { %1144 = vmatpush3.msra.mxu1 %v684_v59 }
 0x138   : > { %v551_v31 = vpop.f32.mrf.mxu0 }
 0x13a   : > { %v1121_v32 = vpop.f32.mrf.mxu0 }
 0x13d   : > { %v625_v33 = vpop.f32.mrf.mxu1 }
 0x13e   : > { %v626_v35 = vadd.f32 %v625_v33, %v551_v31 }
 0x13f   : > { %v1128_v36 = vpop.f32.mrf.mxu1 }
 0x140   : > { %v636_v37 = vadd.f32 %v1074_v34, %v626_v35 }
 0x142   : > { %1265 = vtanh.f32 %v636_v37  ;;  %v1075_v40 = vmul.f32 -1.442695, %v636_v37 }
 0x144   : > { %1267 = vpow2.f32 %v1075_v40 }
 0x14f   : > { %v1266_v38 = vpop.eup %1265 }
 0x150   : > { %650 = vrot.lane.b32.xlu0 %v1266_v38, %s1540_s18 }
 0x151   : > { %v1268_v41 = vpop.eup %1267 }
 0x152   : > { %v640_v42 = vadd.f32 1.0, %v1268_v41 }
 0x154   : > { %645 = vrot.lane.b32.xlu0 %v474_v39, %s1541_s19  ;;  %1269 = vrcp.f32 %v640_v42 }
 0x161   : > { %v1270_v43 = vpop.eup %1269 }
 0x1c2   : > { %v651_v44 = vpop.permute.xlu0 %650 }
 0x1c3   : > { %v653_v45 = vmul.f32 %v1270_v43, %v651_v44 }
 0x1c5   : > { %655 = vrot.lane.b32.xlu1 %v653_v45, %s1541_s19 }
 0x1c6   : > { %v646_v46 = vpop.permute.xlu0 %645 }
 0x1c7   : > { %v648_v47 = vmul.f32 %v1270_v43, %v646_v46 }
 0x237   : > { %v656_v48 = vpop.permute.xlu1 %655 }
 0x238   : > { %v1829_v49 = vadd.f32 %v656_v48, %v648_v47 }
 0x23a   : > { %1271 = vtanh.f32 %v1829_v49 }
 0x247   : > { %v1272_v56 = vpop.eup %1271 }
 0x248   : > { %661 = vrot.lane.b32.xlu1 %v1272_v56, %s1540_s18 }
 0x24c   : > { %680 = vrot.lane.b32.xlu1 %v676_v58, %s1541_s19 }
 0x250   : > { %782 = vrot.lane.b32.xlu1 %v678_v60, %s1541_s19 }
 0x2ba   : > { %v662_v61 = vpop.permute.xlu1 %661 }
 0x2bb   : > { %v664_v62 = vmul.f32 %v1270_v43, %v662_v61 }
 0x2bd   : > { %666 = vrot.lane.b32.xlu0 %v664_v62, %s1541_s19 }
 0x2be   : > { %v681_v63 = vpop.permute.xlu1 %680 }
 0x2c2   : > { %v783_v14 = vpop.permute.xlu1 %782 }
 0x32f   : > { %v667_v0 = vpop.permute.xlu0 %666 }
 0x330   : > { %669 = vst.msk [vmem:[#allocation13] sm:$0xff] %vm1967_vm12, %v667_v0  ;;  %v683_v1 = vsel %vm1968_vm14, %v667_v0, %v681_v63 }
 0x331   : > { %1146 = vmatmul.mubr.msk.f32.vlgmr.msra.gmra.mxu1 %vm700_vm2, %v683_v1 }
 0x3f1   : > { %v770_v3 = vpop.f32.mrf.mxu1 }
 0x3f2   : > { %v771_v4 = vadd.f32 %v1076_v2, %v770_v3 }
 0x3f3   : > { %v1147_v5 = vpop.f32.mrf.mxu1 }
 0x3f4   : > { %1273 = vtanh.f32 %v771_v4  ;;  %v1078_v8 = vmul.f32 -1.442695, %v771_v4 }
 0x3f6   : > { %1275 = vpow2.f32 %v1078_v8 }
 0x401   : > { %v1274_v7 = vpop.eup %1273 }
 0x402   : > { %787 = vrot.lane.b32.xlu0 %v1274_v7, %s1540_s18 }
 0x403   : > { %v1276_v9 = vpop.eup %1275 }
 0x404   : > { %v777_v10 = vadd.f32 1.0, %v1276_v9 }
 0x406   : > { %1277 = vrcp.f32 %v777_v10 }
 0x413   : > { %v1278_v11 = vpop.eup %1277 }
 0x414   : > { %v785_v15 = vmul.f32 %v1278_v11, %v783_v14 }
 0x474   : > { %v788_v12 = vpop.permute.xlu0 %787 }
 0x475   : > { %v790_v13 = vmul.f32 %v1278_v11, %v788_v12 }
 0x477   : > { %792 = vrot.lane.b32.xlu0 %v790_v13, %s1541_s19 }
 0x4e9   : > { %v793_v16 = vpop.permute.xlu0 %792 }
 0x4ea   : > { %v795_v17 = vadd.f32 %v793_v16, %v785_v15 }
 0x4ec   : > { %1279 = vtanh.f32 %v795_v17 }
 0x4f9   : > { %v1280_v22 = vpop.eup %1279 }
 0x4fa   : > { %798 = vrot.lane.b32.xlu1 %v1280_v22, %s1540_s18  ;;  %s1542_s18 = smov 96  }
 0x56c   : > { %v799_v23 = vpop.permute.xlu1 %798 }
 0x56d   : > { %v801_v24 = vmul.f32 %v1278_v11, %v799_v23 }
 0x56f   : > { %803 = vrot.lane.b32.xlu0 %v801_v24, %s1541_s19  ;;  %s1543_s19 = smov [#allocation13]  }
 0x570   : > { %s933_s15 = sshll.u32 %s1543_s19, 4  ;;  %s934_s15 = int_to_ptr.vmem [resolvable:$true] %s933_s15 }
 0x571   : > { %s1401_s4 = scalar_lea.vmem %s934_s15, 256  ;;  %p1408_p1 = scmp.lt.s32.totalorder %s934_s15, %s934_s15 }
 0x572   : > { %p1402_p12 = scmp.ne.s32.totalorder %s934_s15, %s1401_s4  ;;  %p1409_p9 = scmp.lt.s32.totalorder %s1401_s4, %s1401_s4 }
 0x574   : > { %p1403_p11 = pnand %p1402_p12, %p1972_p7  ;;  %p1410_p5 = por %p1409_p9, %p1408_p1 }
 0x576   : > { %p1404_p0 = pneg %p1403_p11 }
 0x578   : > { %p1411_p13 = pnand %p1410_p5, %p1404_p0 }
 0x5e1   : > { %v804_v25 = vpop.permute.xlu0 %803 }
 0x5e2   : > { %806 = vst.msk [vmem:[#allocation13 + $0x8] sm:$0xff] %vm1969_vm15, %v804_v25  ;;  %1157 = vmatmul.mubr.msk.f32.vlgmr.msra.gmra.mxu0 %vm1970_vm0, %v804_v25 }
 0x6a2   : > { %v891_v27 = vpop.f32.mrf.mxu0 }
 0x6a3   : > { %v892_v28 = vadd.f32 %v1079_v26, %v891_v27 }
 0x6a4   : > { %v1158_v6 = vpop.f32.mrf.mxu0 }
 0x6a5   : > { %v895_v29 = vsel %vm555_vm1, %v892_v28, -inf }
 0x6a6   : > { %896 = vmax.xlane.f32.xlu1 %v895_v29 }
 0x6b7   : > { %808 = vrot.lane.b32.xlu1 %v795_v17, %s1542_s18 }
 0x72f   : > { %v897_v30 = vpop.xlane.xlu1 %896 }
 0x730   : > { %v898_v31 = vsub.f32 %v892_v28, %v897_v30 }
 0x732   : > { %v899_v32 = vmul.f32 1.442695, %v898_v31 }
 0x733   : > { %v809_v33 = vpop.permute.xlu1 %808 }
 0x734   : > { %1281 = vpow2.f32 %v899_v32  ;;  %811 = vst.msk [vmem:[#allocation15 + $0x8] sm:$0xff] %vm1971_vm3, %v809_v33 }
 0x741   : > { %v1282_v34 = vpop.eup %1281 }
 0x742   : > { %v901_v35 = vsel %vm555_vm1, %v1282_v34, 0.0 }
 0x743   : > { %902 = vadd.xlane.f32.xlu0 %v901_v35 }
 0x759   : > { %671 = vrot.lane.b32.xlu0 %v1829_v49, %s1542_s18 }
 0x75a   : > { %1414 = shalt.err (!%p1411_p13)
}
 0x75b   : > { %s1544_s17 = smov 128   ;;  %s1545_s29 = smov 8   ;;  %vm1974_vm5 = vmmov %vm1970_vm0 }
 0x75c   : > { %p1973_p3 = pmov %p1972_p7  ;;  %s1546_s26 = smov [#allocation15]  }
 0x75d   : > { %s946_s20 = sshll.u32 %s1546_s26, 4  ;;  %s947_s20 = int_to_ptr.vmem [resolvable:$true] %s946_s20 }
 0x75e   : > { %1177 = dma.vmem_to_hbm [thread:$0]  (%p1973_p3), %s934_s15, 256, %s1942_s10, [#allocation14], %s1544_s17, %s1544_s17, %s1545_s29  }
 0x75f   : > { %s1425_s18 = scalar_lea.vmem %s947_s20, 256  ;;  %p1975_p8 = pmov %p1973_p3 }
 0x760   : > { %p1426_p6 = scmp.ne.s32.totalorder %s947_s20, %s1425_s18  ;;  %p1432_p12 = scmp.lt.s32.totalorder %s947_s20, %s947_s20 }
 0x761   : > { %p1433_p7 = scmp.lt.s32.totalorder %s1425_s18, %s1425_s18 }
 0x762   : > { %p1427_p4 = pnand %p1426_p6, %p1975_p8 }
 0x763   : > { %p1434_p11 = por %p1433_p7, %p1432_p12 }
 0x764   : > { %p1428_p2 = pneg %p1427_p4 }
 0x766   : > { %p1435_p0 = pnand %p1434_p11, %p1428_p2 }
 0x7cc   : > { %v903_v36 = vpop.xlane.xlu0 %902 }
 0x7cd   : > { %1283 = vlog2.f32 %v903_v36 }
 0x7d0   : > { %v672_v37 = vpop.permute.xlu0 %671 }
 0x7d1   : > { %674 = vst.msk [vmem:[#allocation15] sm:$0xff] %vm1974_vm5, %v672_v37 }
 0x7d2   : > { %1438 = shalt.err (!%p1435_p0)
}
 0x7d3   : > { %p1976_p1 = pmov %p1973_p3  ;;  %s1977_s4 = scalar_lea.vmem [#allocation12], %s1735_s14 }
 0x7d4   : > { %s923_s28 = sshll.u32 %s1977_s4, 4  ;;  %s921_s18 = scalar_lea.hbm %s1941_s9, %s1752_s21  ;;  %s924_s28 = int_to_ptr.vmem [resolvable:$true] %s923_s28 }
 0x7d5   : > { %1179 = dma.vmem_to_hbm [thread:$0]  (%p1976_p1), %s947_s20, 256, %s1943_s11, [#allocation14], %s1544_s17, %s1544_s17, %s1545_s29  }
 0x7d6   : > { %s1978_s1 = smov %s1977_s4  ;;  %s1979_s19 = sand.u32 1, %s1519_s22  }
 0x7d7   : > { %s910_s15 = scalar_lea.sflag [#allocation6], %s1979_s19  ;;  %s1449_s2 = scalar_lea.vmem %s924_s28, 128 }
 0x7d8   : > { %p1450_p9 = scmp.ne.s32.totalorder %s924_s28, %s1449_s2  ;;  %s1547_s17 = smov [#allocation12]  }
 0x7d9   : > { %s1453_s29 = sshll.u32 %s1547_s17, 4  ;;  %s1454_s29 = int_to_ptr.vmem [resolvable:$false] %s1453_s29 }
 0x7da   : > { %v1284_v38 = vpop.eup %1283  ;;  %p1451_p5 = pnand %p1450_p9, %p1651_p10  ;;  %s1455_s20 = scalar_lea.vmem %s1454_s29, 256 }
 0x7db   : > { %v905_v39 = vmul.f32 0.6931472, %v1284_v38  ;;  %p1456_p3 = scmp.lt.s32.totalorder %s924_s28, %s1454_s29  ;;  %p1457_p6 = scmp.lt.s32.totalorder %s1455_s20, %s1449_s2 }
 0x7dc   : > { %p1452_p13 = pneg %p1451_p5 }
 0x7dd   : > { %v906_v40 = vadd.f32 %v905_v39, %v897_v30  ;;  %p1458_p8 = por %p1457_p6, %p1456_p3 }
 0x7df   : > { %v907_v41 = vsub.f32 %v892_v28, %v906_v40  ;;  %p1459_p4 = pnand %p1458_p8, %p1452_p13 }
 0x7e1   : > { %908 = vst.msk [vmem:[%s1978_s1] sm:$0xff] %vm555_vm1, %v907_v41 }
 0x7e2   : > { %1462 = shalt.err (!%p1459_p4)
}
 0x7e3   : > { %s1463_s21 = scalar_lea.hbm %s921_s18, 128  ;;  %s1467_s4 = scalar_lea.hbm %s1941_s9, 1024 }
 0x7e4   : > { %p1464_p2 = scmp.ne.s32.totalorder %s921_s18, %s1463_s21  ;;  %p1468_p11 = scmp.lt.s32.totalorder %s921_s18, %s1941_s9 }
 0x7e5   : > { %p1469_p0 = scmp.lt.s32.totalorder %s1467_s4, %s1463_s21 }
 0x7e6   : > { %p1465_p12 = pnand %p1464_p2, %p1651_p10 }
 0x7e7   : > { %p1470_p1 = por %p1469_p0, %p1468_p11 }
 0x7e8   : > { %p1466_p7 = pneg %p1465_p12 }
 0x7ea   : > { %p1471_p9 = pnand %p1470_p1, %p1466_p7 }
 0x7ec   : > { %1474 = shalt.err (!%p1471_p9)
}
 0x7ed   : > { %1175 = dma.vmem_to_hbm [thread:$0]  (%p1651_p10), %s924_s28, 128, %s921_s18, %s910_s15  }
 0x7ee   : > { %p1980_p5 = scmp.eq.s32.totalorder %s1632_s25, 7 }
 0x7f0   : > { %1506 = dma.done.wait (%p1980_p5), [#allocation14], 512   ;;  %p1981_p13 = pmov %p1980_p5 }
 0x7f2   : > { %1508 = vsyncadd (%p1981_p13), [#allocation14], 4294966784 }
 0x7f3 PF: > { %p1214_p3 = scmp.ge.s32.totalorder %s1527_s24, 2  ;;  %s969_s2 = sand.u32 1, %s1515_s0  }
 0x7f4   : > { %p1982_p6 = scmp.ne.s32.totalorder %s1953_s13, 0  ;;  %s970_s19 = scalar_lea.sflag [#allocation6], %s969_s2 }
 0x7f6   : > { %p1199_p8 = pnand %p1214_p3, %p1982_p6 }
 0x7f8   : > { %p1200_p4 = pneg %p1199_p8 }
 0x7fa   : > { %1510 = dma.done.wait (%p1200_p4), %s970_s19, 128  }
 0x7fb   : > { %1512 = vsyncadd (%p1200_p4), %s970_s19, 4294967168  ;;  %p32_p10 = scmp.ge.s32.totalorder %s1636_s27, 10   ;;  %s1983_s0 = smov %s1519_s22 }
 0x7fc   : > { %s1984_s22 = smov %s1523_s23  ;;  %s1985_s23 = smov %s1647_s30 }
 0x7fd   : > { %s1986_s24 = smov %s1636_s27  ;;  %34 = sbr.rel (!%p32_p10) target bundleno = 23 (0x17), region = 124 }
 0x802   :  { %975 = vsyncpa [#allocation5], 1 }
 0x803   :  { %977 = vsyncpa [#allocation5 + $0x1], 1 }
 0x804   :  { %978 = vsyncpa [#allocation8], 1 }
 0x805   :  { %979 = vsyncpa [#allocation11], 1 }
 0x806   :  { %980 = vsyncpa [#allocation6], 1 }
 0x807   :  { %982 = vsyncpa [#allocation6 + $0x1], 1 }
 0x808   :  { %983 = vsyncpa [#allocation14], 1 }

</bundles_post_ra>
